<compile_context>
chip_gen: v7x
topology: tpu7x:2x2x1
jax: 0.10.0
libtpu: 0.0.40
codegen_flags: <defaults>
</compile_context>

<pallas_src>
import numpy as np
import jax
import jax.numpy as jnp
from jax.experimental import pallas as pl
from jax.experimental.pallas import tpu as pltpu


def _glinear_kernel(x_ref, w_ref, b_ref, o_ref, acc_ref):
    # x_ref: (tm, nb, tk)  w_ref: (nb, tk, tn)  b_ref: (1, nb, tn)
    # o_ref: (tm, nb, tn)  acc_ref: (nb, tm, tn) f32 scratch
    k = pl.program_id(2)

    @pl.when(k == 0)
    def _init():
        acc_ref[...] = jnp.zeros_like(acc_ref)

    # Move the block dim to the front once (on-chip) so the batched matmul has
    # a leading batch dim and the accumulator needs no per-step transpose.
    x_bmk = jnp.swapaxes(x_ref[...], 0, 1)                      # (nb, tm, tk)
    acc_ref[...] += jax.lax.dot_general(
        x_bmk, w_ref[...],
        dimension_numbers=(((2,), (1,)), ((0,), (0,))),
        preferred_element_type=jnp.float32)                     # (nb, tm, tn)

    @pl.when(k == pl.num_programs(2) - 1)
    def _finalize():
        out = jnp.swapaxes(acc_ref[...], 0, 1)                  # (tm, nb, tn)
        o_ref[...] = (out + b_ref[...]).astype(o_ref.dtype)


def _glinear_kernel_nobias(x_ref, w_ref, o_ref, acc_ref):
    k = pl.program_id(2)

    @pl.when(k == 0)
    def _init():
        acc_ref[...] = jnp.zeros_like(acc_ref)

    x_bmk = jnp.swapaxes(x_ref[...], 0, 1)
    acc_ref[...] += jax.lax.dot_general(
        x_bmk, w_ref[...],
        dimension_numbers=(((2,), (1,)), ((0,), (0,))),
        preferred_element_type=jnp.float32)

    @pl.when(k == pl.num_programs(2) - 1)
    def _finalize():
        o_ref[...] = jnp.swapaxes(acc_ref[...], 0, 1).astype(o_ref.dtype)


def _pick_tile(dim, target, align):
    """Largest multiple of `align` that divides `dim` and is <= target, else
    the full dim (full-extent blocks are always layout-legal)."""
    if dim <= target:
        return dim
    t = (target // align) * align
    while t >= align:
        if dim % t == 0:
            return t
        t -= align
    return dim


def _choose_tiles(batch, num_blocks, din, dout, in_itemsize, out_itemsize,
                  vmem_budget_bytes=24 * 1024 * 1024):
    """MXU-friendly (128/256-aligned) tiles under a conservative VMEM budget
    that also fits v7x's 64 MiB/TC VMEM with double-buffering headroom."""
    tgt_m, tgt_n, tgt_k = 256, 512, 512
    while True:
        tm = _pick_tile(batch, tgt_m, 8)
        tn = _pick_tile(dout, tgt_n, 128)
        tk = _pick_tile(din, tgt_k, 128)
        vmem = (2 * (tm * num_blocks * tk * in_itemsize      # x tile (dbl buf)
                     + num_blocks * tk * tn * in_itemsize    # w tile
                     + tm * num_blocks * tn * out_itemsize   # out tile
                     + num_blocks * tn * in_itemsize)        # bias tile
                + num_blocks * tm * tn * 4)                  # f32 accumulator
        if vmem <= vmem_budget_bytes or (tgt_m <= 64 and tgt_n <= 128
                                         and tgt_k <= 128):
            return tm, tn, tk
        if tgt_k > 128:          # weight tile is usually the biggest: shrink K,
            tgt_k //= 2
        elif tgt_n > 128:        # then N,
            tgt_n //= 2
        else:                    # then M.
            tgt_m //= 2


def glinear(x, weight, bias=None):
    """x: [batch, num_blocks, din], weight: [num_blocks, din, dout],
    bias: [num_blocks, dout] or None.  Returns [batch, num_blocks, dout]."""
    batch, num_blocks, din = x.shape
    nb_w, din_w, dout = weight.shape
    assert nb_w == num_blocks and din_w == din
    out_dtype = x.dtype

    tm, tn, tk = _choose_tiles(
        batch, num_blocks, din, dout,
        jnp.dtype(x.dtype).itemsize, jnp.dtype(out_dtype).itemsize)
    grid = (batch // tm, dout // tn, din // tk)   # K (reduction) last

    x_spec = pl.BlockSpec((tm, num_blocks, tk), lambda m, n, k: (m, 0, k))
    w_spec = pl.BlockSpec((num_blocks, tk, tn), lambda m, n, k: (0, k, n))
    o_spec = pl.BlockSpec((tm, num_blocks, tn), lambda m, n, k: (m, 0, n))

    out_shape = jax.ShapeDtypeStruct((batch, num_blocks, dout), out_dtype)
    scratch_shapes = [pltpu.VMEM((num_blocks, tm, tn), jnp.float32)]

    flops = 2 * batch * num_blocks * din * dout
    bytes_accessed = (x.size * x.dtype.itemsize
                      + weight.size * weight.dtype.itemsize
                      + batch * num_blocks * dout * jnp.dtype(out_dtype).itemsize
                      + (bias.size * bias.dtype.itemsize if bias is not None else 0))
    cost = pl.CostEstimate(flops=flops, transcendentals=0,
                           bytes_accessed=bytes_accessed)
    compiler_params = pltpu.CompilerParams(
        dimension_semantics=("parallel", "parallel", "arbitrary"),
        vmem_limit_bytes=32 * 1024 * 1024)

    if bias is not None:
        bias3 = bias.reshape(1, num_blocks, dout)
        b_spec = pl.BlockSpec((1, num_blocks, tn), lambda m, n, k: (0, 0, n))
        return pl.pallas_call(
            _glinear_kernel,
            out_shape=out_shape,
            grid=grid,
            in_specs=[x_spec, w_spec, b_spec],
            out_specs=o_spec,
            scratch_shapes=scratch_shapes,
            compiler_params=compiler_params,
            cost_estimate=cost,
        )(x, weight, bias3)
    else:
        return pl.pallas_call(
            _glinear_kernel_nobias,
            out_shape=out_shape,
            grid=grid,
            in_specs=[x_spec, w_spec],
            out_specs=o_spec,
            scratch_shapes=scratch_shapes,
            compiler_params=compiler_params,
            cost_estimate=cost,
        )(x, weight)


def init_glinear_params(key, din, dout, num_blocks, bias=True, a=None):
    """Deterministic init mirroring GLinear.__init__ (uniform(-a, a))."""
    if a is None:
        a = 1.0 / np.sqrt(dout)
    kw, kb = jax.random.split(key)
    weight = jax.random.uniform(
        kw, (num_blocks, din, dout), dtype=jnp.float32, minval=-a, maxval=a)
    if bias:
        b = jax.random.uniform(
            kb, (num_blocks, dout), dtype=jnp.float32, minval=-a, maxval=a)
    else:
        b = None
    return weight, b


if __name__ == "__main__":
    key = jax.random.PRNGKey(0)
    k_x, k_p, k_x2, k_p2 = jax.random.split(key, 4)

    # --- small shape implied by the module (single grid step, with bias) ---
    batch, num_blocks, din, dout = 2, 4, 32, 32
    x = jax.random.normal(k_x, (batch, num_blocks, din), dtype=jnp.float32)
    weight, bias = init_glinear_params(k_p, din, dout, num_blocks, bias=True)

    out = jax.block_until_ready(glinear(x, weight, bias))
    ref = jnp.einsum("bnd,ndo->bno", x, weight) + bias[None, :, :]
    assert out.shape == (batch, num_blocks, dout)
    np.testing.assert_allclose(np.asarray(out), np.asarray(ref),
                               rtol=1e-5, atol=1e-5)

    # --- shape that exercises K-axis tiling + accumulator path (no bias) ---
    batch2, num_blocks2, din2, dout2 = 16, 4, 640, 256
    x2 = jax.random.normal(k_x2, (batch2, num_blocks2, din2), dtype=jnp.float32)
    w2, _ = init_glinear_params(k_p2, din2, dout2, num_blocks2, bias=False)

    out2 = jax.block_until_ready(glinear(x2, w2, None))
    ref2 = jnp.einsum("bnd,ndo->bno", x2, w2)
    assert out2.shape == (batch2, num_blocks2, dout2)
    np.testing.assert_allclose(np.asarray(out2), np.asarray(ref2),
                               rtol=1e-3, atol=1e-3)

    print("KERNEL_OK")
</pallas_src>

<mosaic_0001>
module attributes {stable_mosaic.version = 11 : i64} {
  func.func @_glinear_kernel(%arg0: i32, %arg1: i32, %arg2: i32, %arg3: memref<2x4x32xf32, #tpu.memory_space<vmem>>, %arg4: memref<4x32x32xf32, #tpu.memory_space<vmem>>, %arg5: memref<1x4x32xf32, #tpu.memory_space<vmem>>, %arg6: memref<2x4x32xf32, #tpu.memory_space<vmem>>, %arg7: memref<4x2x32xf32, #tpu.memory_space<vmem>>) attributes {dimension_semantics = [#tpu.dimension_semantics<parallel>, #tpu.dimension_semantics<parallel>, #tpu.dimension_semantics<arbitrary>], iteration_bounds = array<i64: 1, 1, 1>, scalar_prefetch = 0 : i64, scratch_operands = 1 : i64, tpu.core_type = #tpu.core_type<tc>, window_params = [{transform_indices = @transform_0, window_bounds = array<i64: 2, 4, 32>}, {transform_indices = @transform_1, window_bounds = array<i64: 4, 32, 32>}, {transform_indices = @transform_2, window_bounds = array<i64: 1, 4, 32>}, {transform_indices = @transform_3, window_bounds = array<i64: 2, 4, 32>}]} {
    %c0_i32 = arith.constant 0 : i32
    %0 = arith.cmpi eq, %arg2, %c0_i32 : i32
    %1 = arith.extui %0 : i1 to i32
    %c0_i32_0 = arith.constant 0 : i32
    %2 = arith.cmpi ne, %1, %c0_i32_0 : i32
    scf.if %2 {
      %cst_14 = arith.constant 0.000000e+00 : f32
      %13 = vector.broadcast %cst_14 : f32 to vector<4x2x32xf32>
      %c0_15 = arith.constant 0 : index
      %c0_16 = arith.constant 0 : index
      %c0_17 = arith.constant 0 : index
      %14 = vector.load %arg7[%c0_15, %c0_16, %c0_17] : memref<4x2x32xf32, #tpu.memory_space<vmem>>, vector<4x2x32xf32>
      tpu.vector_store %arg7[%c0_15, %c0_16, %c0_17], %13 {strides = array<i32>} : memref<4x2x32xf32, #tpu.memory_space<vmem>>, vector<4x2x32xf32>,
    } else {
    }
    %c0 = arith.constant 0 : index
    %c0_1 = arith.constant 0 : index
    %c0_2 = arith.constant 0 : index
    %3 = vector.load %arg3[%c0, %c0_1, %c0_2] : memref<2x4x32xf32, #tpu.memory_space<vmem>>, vector<2x4x32xf32>
    %4 = tpu.transpose %3, [1, 0, 2] : vector<2x4x32xf32> -> vector<4x2x32xf32>
    %c0_3 = arith.constant 0 : index
    %c0_4 = arith.constant 0 : index
    %c0_5 = arith.constant 0 : index
    %5 = vector.load %arg7[%c0_3, %c0_4, %c0_5] : memref<4x2x32xf32, #tpu.memory_space<vmem>>, vector<4x2x32xf32>
    %c0_6 = arith.constant 0 : index
    %c0_7 = arith.constant 0 : index
    %c0_8 = arith.constant 0 : index
    %6 = vector.load %arg4[%c0_6, %c0_7, %c0_8] : memref<4x32x32xf32, #tpu.memory_space<vmem>>, vector<4x32x32xf32>
    %cst = arith.constant dense<0.000000e+00> : vector<4x2x32xf32>
    %7 = tpu.matmul %4, %6, %cst {dimension_numbers = #tpu.dot_dimension_numbers<[2], [1], [1], [2], [0, 0, 0, 1, 1, 2], [0], [0]>} : vector<4x2x32xf32>, vector<4x32x32xf32>, vector<4x2x32xf32> -> vector<4x2x32xf32>
    %8 = arith.addf %5, %7 : vector<4x2x32xf32>
    %c0_9 = arith.constant 0 : index
    %c0_10 = arith.constant 0 : index
    %c0_11 = arith.constant 0 : index
    %9 = vector.load %arg7[%c0_9, %c0_10, %c0_11] : memref<4x2x32xf32, #tpu.memory_space<vmem>>, vector<4x2x32xf32>
    tpu.vector_store %arg7[%c0_9, %c0_10, %c0_11], %8 {strides = array<i32>} : memref<4x2x32xf32, #tpu.memory_space<vmem>>, vector<4x2x32xf32>,
    %c0_i32_12 = arith.constant 0 : i32
    %10 = arith.cmpi eq, %arg2, %c0_i32_12 : i32
    %11 = arith.extui %10 : i1 to i32
    %c0_i32_13 = arith.constant 0 : i32
    %12 = arith.cmpi ne, %11, %c0_i32_13 : i32
    scf.if %12 {
      %c0_14 = arith.constant 0 : index
      %c0_15 = arith.constant 0 : index
      %c0_16 = arith.constant 0 : index
      %13 = vector.load %arg7[%c0_14, %c0_15, %c0_16] : memref<4x2x32xf32, #tpu.memory_space<vmem>>, vector<4x2x32xf32>
      %14 = tpu.transpose %13, [1, 0, 2] : vector<4x2x32xf32> -> vector<2x4x32xf32>
      %c0_17 = arith.constant 0 : index
      %c0_18 = arith.constant 0 : index
      %c0_19 = arith.constant 0 : index
      %15 = vector.load %arg5[%c0_17, %c0_18, %c0_19] : memref<1x4x32xf32, #tpu.memory_space<vmem>>, vector<1x4x32xf32>
      %16 = vector.broadcast %15 : vector<1x4x32xf32> to vector<2x4x32xf32>
      %17 = arith.addf %14, %16 : vector<2x4x32xf32>
      %c0_20 = arith.constant 0 : index
      %c0_21 = arith.constant 0 : index
      %c0_22 = arith.constant 0 : index
      %18 = vector.load %arg6[%c0_20, %c0_21, %c0_22] : memref<2x4x32xf32, #tpu.memory_space<vmem>>, vector<2x4x32xf32>
      tpu.vector_store %arg6[%c0_20, %c0_21, %c0_22], %17 {strides = array<i32>} : memref<2x4x32xf32, #tpu.memory_space<vmem>>, vector<2x4x32xf32>,
    } else {
    }
    return
  }
  func.func @transform_0(%arg0: i32, %arg1: i32, %arg2: i32) -> (i32, i32, i32) {
    %c0_i32 = arith.constant 0 : i32
    %c0_i32_0 = arith.constant 0 : i32
    return %arg0, %c0_i32, %arg2 : i32, i32, i32
  }
  func.func @transform_1(%arg0: i32, %arg1: i32, %arg2: i32) -> (i32, i32, i32) {
    %c0_i32 = arith.constant 0 : i32
    %c0_i32_0 = arith.constant 0 : i32
    return %c0_i32, %arg2, %arg1 : i32, i32, i32
  }
  func.func @transform_2(%arg0: i32, %arg1: i32, %arg2: i32) -> (i32, i32, i32) {
    %c0_i32 = arith.constant 0 : i32
    %c0_i32_0 = arith.constant 0 : i32
    %c0_i32_1 = arith.constant 0 : i32
    return %c0_i32, %c0_i32_0, %arg1 : i32, i32, i32
  }
  func.func @transform_3(%arg0: i32, %arg1: i32, %arg2: i32) -> (i32, i32, i32) {
    %c0_i32 = arith.constant 0 : i32
    %c0_i32_0 = arith.constant 0 : i32
    return %arg0, %c0_i32, %arg1 : i32, i32, i32
  }
}

</mosaic_0001>

<bundles_post_ra>
// kernel: tpu_custom_call.1
= control target key start
LH: loop header
LB: loop body
LE: loop exit
PB: predicated region body
PF: predicated region fallthrough
CT: control target
= control target key end

     0   :  { %8 = vsyncpa [#allocation4], 0  ;;  %s762_s0 = inlined_call_operand.hbm [shape: f32[2,4,32], index: 0, kind: input, shape index: {}]   ;;  %s763_s1 = inlined_call_operand.hbm [shape: f32[4,32,32], index: 1, kind: input, shape index: {}]   ;;  %s764_s2 = inlined_call_operand.vmem [shape: f32[1,4,32], index: 2, kind: input, shape index: {}]   ;;  %s765_s3 = inlined_call_operand.hbm [shape: f32[2,4,32], index: 3, kind: output, shape index: {}]  }
   0x1   :  { %9 = vsyncpa [#allocation7], 0 }
   0x2   :  { %10 = vsyncpa [#allocation5], 0  ;;  %s646_s12 = smov [#allocation3]   ;;  %s574_s16 = scalar_lea.hbm %s762_s0, 128 }
   0x3   :  { %s16_s13 = sshll.u32 %s646_s12, 4  ;;  %p575_p0 = scmp.ne.s32.totalorder %s762_s0, %s574_s16  ;;  %s17_s13 = int_to_ptr.vmem [resolvable:$true] %s16_s13 }
   0x4   :  { %p578_p1 = scmp.lt.u32.totalorder %s574_s16, %s762_s0 }
   0x6   :  { %p580_p2 = pnand %p578_p1, %p575_p0 }
   0x8   :  { %583 = shalt.err (!%p580_p2)
}
   0x9   :  { %s584_s21 = scalar_lea.vmem %s17_s13, 128  ;;  %p589_p4 = scmp.lt.s32.totalorder %s17_s13, %s17_s13 }
   0xa   :  { %p585_p3 = scmp.ne.s32.totalorder %s17_s13, %s584_s21  ;;  %p590_p5 = scmp.lt.s32.totalorder %s584_s21, %s584_s21 }
   0xc   :  { %p591_p6 = por %p590_p5, %p589_p4 }
   0xe   :  { %p592_p7 = pnand %p591_p6, %p585_p3 }
  0x10   :  { %595 = shalt.err (!%p592_p7)
}
  0x11   :  { %s647_s22 = smov 64   ;;  %s648_s23 = smov 4  }
  0x12   :  { %22 = dma.hbm_to_vmem [thread:$0]  %s762_s0, 128, %s17_s13, [#allocation4], %s647_s22, %s647_s22, %s648_s23  }
  0x13   :  { %s649_s26 = smov [#allocation6]   ;;  %s596_s30 = scalar_lea.hbm %s763_s1, 2048 }
  0x14   :  { %s28_s27 = sshll.u32 %s649_s26, 4  ;;  %p597_p8 = scmp.ne.s32.totalorder %s763_s1, %s596_s30  ;;  %s29_s27 = int_to_ptr.vmem [resolvable:$true] %s28_s27 }
  0x15   :  { %p600_p9 = scmp.lt.u32.totalorder %s596_s30, %s763_s1 }
  0x17   :  { %p602_p10 = pnand %p600_p9, %p597_p8 }
  0x19   :  { %605 = shalt.err (!%p602_p10)
}
  0x1a   :  { %s606_s8 = scalar_lea.vmem %s29_s27, 2048  ;;  %p611_p12 = scmp.lt.s32.totalorder %s29_s27, %s29_s27 }
  0x1b   :  { %p607_p11 = scmp.ne.s32.totalorder %s29_s27, %s606_s8  ;;  %p612_p13 = scmp.lt.s32.totalorder %s606_s8, %s606_s8 }
  0x1d   :  { %p613_p0 = por %p612_p13, %p611_p12 }
  0x1f   :  { %p614_p1 = pnand %p613_p0, %p607_p11 }
  0x21   :  { %617 = shalt.err (!%p614_p1)
}
  0x22   :  { %s650_s0 = smov 128   ;;  %s651_s9 = smov 8  }
  0x23   :  { %34 = dma.hbm_to_vmem [thread:$0]  %s763_s1, 2048, %s29_s27, [#allocation7], %s650_s0, %s650_s0, %s651_s9  }
  0x24   :  { %640 = dma.done.wait [#allocation4], 128  }
  0x25   :  { %641 = vsyncadd [#allocation4], 4294967168 }
  0x26   :  { %642 = dma.done.wait [#allocation7], 2048  }
  0x27   :  { %643 = vsyncadd [#allocation7], 4294965248  ;;  %v652_v0 = vmov 0.0|0.0   ;;  %v73_v1 = vlaneseq  ;;  %vm47_vm0 = vcmask 254976   ;;  %vm653_vm1 = vmmov 0   ;;  %v90_v7 = vld [vmem:[#allocation6] sm:$0xff] }
  0x28   :  { %534 = vmatprep.subr.bf16.mxu0 %v652_v0  ;;  %540 = vmatprep.subr.bf16.mxu1 %v652_v0  ;;  %v654_v2 = vmov 0.0   ;;  %v655_v3 = vmov 1934713408   ;;  %v91_v8 = vld [vmem:[#allocation6 + $0x8] sm:$0xff]  ;;  %v94_v9 = vld [vmem:[#allocation6 + $0x20] sm:$0xff]  ;;  %v92_v12 = vld [vmem:[#allocation6 + $0x10] sm:$0xff] }
  0x29   :  { %498 = vmatprep.mubr.msk.f32.mxu0 %vm653_vm1, %v654_v2  ;;  %509 = vmatprep.mubr.msk.f32.mxu1 %vm653_vm1, %v654_v2  ;;  %v71_v4 = vunpack.c.l.s4 %v655_v3  ;;  %48 = vst.msk [vmem:[#allocation2] sm:$0x3] %vm47_vm0, %v654_v2  ;;  %49 = vst.msk [vmem:[#allocation2 + $0x2] sm:$0x3] %vm47_vm0, %v654_v2  ;;  %v74_v6 = vshrl.u32 %v73_v1, 7  ;;  %v535_v10 = vpack.c.bf16 %v91_v8, %v90_v7  ;;  %v95_v11 = vld [vmem:[#allocation6 + $0x28] sm:$0xff] }
  0x2a   :  { %50 = vst.msk [vmem:[#allocation2 + $0x4] sm:$0x3] %vm47_vm0, %v654_v2  ;;  %51 = vst.msk [vmem:[#allocation2 + $0x6] sm:$0x3] %vm47_vm0, %v654_v2  ;;  %v93_v13 = vld [vmem:[#allocation6 + $0x18] sm:$0xff]  ;;  %v541_v14 = vpack.c.bf16 %v95_v11, %v94_v9  ;;  %v96_v15 = vld [vmem:[#allocation6 + $0x30] sm:$0xff] }
  0x2b   :  { %v72_v5 = vunpack.c.0.s8 %v71_v4  ;;  %v97_v16 = vld [vmem:[#allocation6 + $0x38] sm:$0xff]  ;;  %536 = vmatpush3.bf16.msra.mxu0 %v535_v10  ;;  %v538_v19 = vpack.c.bf16 %v93_v13, %v92_v12  ;;  %v98_v23 = vld [vmem:[#allocation6 + $0x40] sm:$0xff]  ;;  %v99_v24 = vld [vmem:[#allocation6 + $0x48] sm:$0xff]  ;;  %vm106_vm2 = vcmask 261120   ;;  %vm443_vm3 = vcmask 257024   ;;  %s656_s13 = smov [#allocation8]  }
  0x2c   :  { %v464_v17 = vld.sshfl [vmem:[#allocation3] sm:$0x33 pattern:$0x76325410]  ;;  %542 = vmatpush3.bf16.msra.mxu1 %v541_v14  ;;  %537 = vmatprep.subr.bf16.mxu0 %v652_v0  ;;  %v544_v21 = vpack.c.bf16 %v97_v16, %v96_v15  ;;  %v102_v25 = vld [vmem:[#allocation6 + $0x60] sm:$0xff]  ;;  %v103_v26 = vld [vmem:[#allocation6 + $0x68] sm:$0xff]  ;;  %v547_v29 = vpack.c.bf16 %v99_v24, %v98_v23 }
  0x2d   :  { %v718_v18 = vsub.s32 %v72_v5, %v74_v6  ;;  %v465_v20 = vld.sshfl [vmem:[#allocation3 + $0x4] sm:$0x33 pattern:$0x76325410]  ;;  %543 = vmatprep.subr.bf16.mxu1 %v652_v0  ;;  %v553_v31 = vpack.c.bf16 %v103_v26, %v102_v25  ;;  %v100_v32 = vld [vmem:[#allocation6 + $0x50] sm:$0xff]  ;;  %s451_s14 = sshll.u32 %s656_s13, 4  ;;  %s452_s14 = int_to_ptr.vmem [resolvable:$true] %s451_s14 }
  0x2e   :  { %v68_v22 = vcombine.low %v464_v17, %v465_v20  ;;  %v69_v28 = vcombine.high %v464_v17, %v465_v20  ;;  %v101_v33 = vld [vmem:[#allocation6 + $0x58] sm:$0xff]  ;;  %v104_v34 = vld [vmem:[#allocation6 + $0x70] sm:$0xff]  ;;  %s618_s15 = scalar_lea.vmem %s452_s14, 128  ;;  %p623_p3 = scmp.lt.s32.totalorder %s452_s14, %s452_s14 }
  0x2f   :  { %539 = vmatpush3.bf16.msra.mxu0 %v538_v19  ;;  %v105_v35 = vld [vmem:[#allocation6 + $0x78] sm:$0xff]  ;;  %v550_v36 = vpack.c.bf16 %v101_v33, %v100_v32  ;;  %v440_v59 = vld [vmem:[%s764_s2] sm:$0xf]  ;;  %p619_p2 = scmp.ne.s32.totalorder %s452_s14, %s618_s15  ;;  %p624_p4 = scmp.lt.s32.totalorder %s618_s15, %s618_s15 }
  0x30   :  { %v76_v27 = vrot.slane %v68_v22, %v718_v18  ;;  %545 = vmatpush3.bf16.msra.mxu1 %v544_v21  ;;  %546 = vmatprep.subr.bf16.mxu0 %v652_v0  ;;  %v83_v37 = vrot.slane %v69_v28, %v718_v18  ;;  %v556_v38 = vpack.c.bf16 %v105_v35, %v104_v34  ;;  %v86_v40 = vld [vmem:[#allocation2] sm:$0x3]  ;;  %v87_v41 = vld [vmem:[#allocation2 + $0x2] sm:$0x3] }
  0x31   :  { %552 = vmatprep.subr.bf16.mxu1 %v652_v0  ;;  %v88_v48 = vld [vmem:[#allocation2 + $0x4] sm:$0x3]  ;;  %v89_v49 = vld [vmem:[#allocation2 + $0x6] sm:$0x3]  ;;  %p625_p5 = por %p624_p4, %p623_p3 }
  0x32   :  { %v84_v30 = vcombine.high %v76_v27, %v654_v2  ;;  %499 = vmatmul.mubr.msk.f32.vlgmr.msra.gmra.mrb[0].mxu0 %vm106_vm2, %v76_v27  ;;  %v85_v39 = vcombine.high %v83_v37, %v654_v2 }
  0x33   :  { %548 = vmatpush3.bf16.msra.mxu0 %v547_v29  ;;  %520 = vmatprep.mubr.msk.f32.mxu0 %vm653_vm1, %v654_v2  ;;  %p626_p6 = pnand %p625_p5, %p619_p2 }
  0x34   :  { %510 = vmatmul.mubr.msk.f32.vlgmr.msra.gmra.mrb[0].mxu1 %vm106_vm2, %v84_v30  ;;  %549 = vmatprep.subr.bf16.mxu0 %v652_v0 }
  0x35   :  { %554 = vmatpush3.bf16.msra.mxu1 %v553_v31  ;;  %531 = vmatprep.mubr.msk.f32.mxu1 %vm653_vm1, %v654_v2 }
  0x36   :  { %555 = vmatprep.subr.bf16.mxu1 %v652_v0 }
  0x37   :  { %551 = vmatpush3.bf16.msra.mxu0 %v550_v36 }
  0x39   :  { %557 = vmatpush3.bf16.msra.mxu1 %v556_v38 }
  0x3a   :  { %521 = vmatmul.mubr.msk.f32.vlgmr.msra.gmra.mrb[2].mxu0 %vm106_vm2, %v83_v37 }
  0x3c   :  { %532 = vmatmul.mubr.msk.f32.vlgmr.msra.gmra.mrb[2].mxu1 %vm106_vm2, %v85_v39 }
 0x105   :  { %v176_v42 = vpop.f32.mrb[0].mxu0 }
 0x106   :  { %v399_v43 = vadd.f32 %v176_v42, %v86_v40  ;;  %v500_v45 = vpop.f32.mrb[1].mxu0 }
 0x107   :  { %v249_v44 = vpop.f32.mrb[0].mxu1 }
 0x108   :  { %v400_v46 = vadd.f32 %v249_v44, %v87_v41  ;;  %v511_v47 = vpop.f32.mrb[1].mxu1  ;;  %404 = vst.msk [vmem:[#allocation2] sm:$0x3] %vm47_vm0, %v399_v43 }
 0x10a   :  { %405 = vst.msk [vmem:[#allocation2 + $0x2] sm:$0x3] %vm47_vm0, %v400_v46 }
 0x10d   :  { %v322_v50 = vpop.f32.mrb[2].mxu0 }
 0x10e   :  { %v401_v51 = vadd.f32 %v322_v50, %v88_v48  ;;  %v522_v53 = vpop.f32.mrb[3].mxu0 }
 0x10f   :  { %v395_v52 = vpop.f32.mrb[2].mxu1 }
 0x110   :  { %v402_v54 = vadd.f32 %v395_v52, %v89_v49  ;;  %v533_v55 = vpop.f32.mrb[3].mxu1  ;;  %406 = vst.msk [vmem:[#allocation2 + $0x4] sm:$0x3] %vm47_vm0, %v401_v51 }
 0x112   :  { %407 = vst.msk [vmem:[#allocation2 + $0x6] sm:$0x3] %vm47_vm0, %v402_v54 }
 0x117   :  { %v572_v56 = vld.sshfl [vmem:[#allocation2] sm:$0xf pattern:$0x76325410] }
 0x119   :  { %v573_v57 = vld.sshfl [vmem:[#allocation2 + $0x2] sm:$0xf pattern:$0x76325410] }
 0x11a   :  { %v431_v58 = vcombine.low %v572_v56, %v573_v57 }
 0x11c   :  { %v438_v60 = vrot.slane %v431_v58, %v718_v18 }
 0x11e   :  { %v439_v61 = vcombine.high %v438_v60, %v654_v2  ;;  %v441_v62 = vadd.f32 %v440_v59, %v438_v60 }
 0x120   :  { %v442_v63 = vadd.f32 %v440_v59, %v439_v61  ;;  %444 = vst.msk [vmem:[#allocation8] sm:$0xf] %vm443_vm3, %v441_v62 }
 0x122   :  { %445 = vst.msk [vmem:[#allocation8 + $0x4] sm:$0xf] %vm443_vm3, %v442_v63 }
 0x123   :  { %629 = shalt.err (!%p626_p6)
}
 0x124   :  { %s630_s17 = scalar_lea.hbm %s765_s3, 128 }
 0x125   :  { %p631_p7 = scmp.ne.s32.totalorder %s765_s3, %s630_s17  ;;  %p634_p8 = scmp.lt.u32.totalorder %s630_s17, %s765_s3 }
 0x127   :  { %p636_p9 = pnand %p634_p8, %p631_p7 }
 0x129   :  { %639 = shalt.err (!%p636_p9)
}
 0x12a   :  { %457 = dma.vmem_to_hbm [thread:$0]  %s452_s14, 128, %s765_s3, [#allocation5], %s647_s22, %s647_s22, %s648_s23  }
 0x12b   :  { %644 = dma.done.wait [#allocation5], 128  }
 0x12c   :  { %645 = vsyncadd [#allocation5], 4294967168 }
 0x12d   :  { %461 = vsyncpa [#allocation4], 1 }
 0x12e   :  { %462 = vsyncpa [#allocation7], 1 }
 0x12f   :  { %463 = vsyncpa [#allocation5], 1 }

</bundles_post_ra>
